<compile_context>
chip_gen: v6e
topology: v6e:2x2x1
jax: 0.10.0
libtpu: 0.0.40
codegen_flags: <defaults>
</compile_context>

<pallas_src>
import functools

import jax
import jax.numpy as jnp
from jax.experimental import pallas as pl
from jax.experimental.pallas import tpu as pltpu

EPS = 1e-5
_LANE = 128


def _round_up(n, m):
    return ((n + m - 1) // m) * m


# ----------------------------------------------------------------------------
# Folded-layout helpers: (B, R, C) <-> (R, B*C), column index n = b*C + c.
# ----------------------------------------------------------------------------
def _fold_x(x, n_pad):
    """(B, L, C) -> (L, n_pad) zero-padded on the lane axis."""
    B, L, C = x.shape
    x2 = jnp.transpose(x, (1, 0, 2)).reshape(L, B * C)
    if n_pad > B * C:
        x2 = jnp.pad(x2, ((0, 0), (0, n_pad - B * C)))
    return x2


def _pad_cols(p, n_pad, value):
    n = p.shape[1]
    if n_pad > n:
        p = jnp.pad(p, ((0, 0), (0, n_pad - n)), constant_values=value)
    return p


def _unfold(y2, B, C):
    """(R, >=B*C) -> (B, R, C)."""
    R = y2.shape[0]
    return jnp.transpose(y2[:, :B * C].reshape(R, B, C), (1, 0, 2))


def _choose_lane_tile(L, P, n_cols, vmem_budget_bytes=8 << 20):
    """Largest 128-multiple column tile whose per-step VMEM footprint
    (double-buffered x/out blocks + live f32 intermediates) fits the budget,
    capped at 1024 lanes.  When there are enough columns the tile is shrunk so
    the grid has >= 8 steps (pipelining + work for both v7x TensorCores)."""
    bytes_per_col = 4 * (2 * L + 2 * P + L + P + 12)
    tile = (vmem_budget_bytes // max(bytes_per_col, 1)) // _LANE * _LANE
    tile = int(max(_LANE, min(tile, 8 * _LANE)))
    n128 = _round_up(n_cols, _LANE)
    tile = min(tile, n128)
    if n128 >= 8 * _LANE:
        tile = min(tile, max(_LANE, (n128 // 8) // _LANE * _LANE))
    return tile


# ----------------------------------------------------------------------------
# Fused kernel: RevIN normalize -> linear forecast -> RevIN denormalize.
# Only `out` (+ tiny mean/std) is written to HBM; xn/pred never leave VMEM.
# ----------------------------------------------------------------------------
def _fused_kernel(x_ref, w_ref, b_ref, g_ref, bt_ref,
                  out_ref, mean_ref, std_ref, *, use_bf16_matmul=False):
    x = x_ref[...]                                    # (L, Nt)  time x folded cols
    L = x.shape[0]
    gamma = g_ref[...]                                # (1, Nt)
    beta = bt_ref[...]                                # (1, Nt)

    # Per-column stats over time (two cross-sublane reductions).
    mean = jnp.sum(x, axis=0, keepdims=True) * (1.0 / L)
    diff = x - mean
    var = jnp.sum(diff * diff, axis=0, keepdims=True) * (1.0 / L)
    std = jnp.sqrt(var + EPS)

    # Fold affine + 1/std into one scale/shift -> a single FMA per element.
    scale = gamma * pl.reciprocal(std, approx=False)          # gamma / std
    shift = beta - mean * scale
    xn = x * scale + shift                                     # (x-mean)/std*gamma + beta

    # Forecast model (fm): one lane-dense MXU matmul (P, L) @ (L, Nt) + bias.
    w = w_ref[...]
    if use_bf16_matmul:
        pred = jnp.dot(w.astype(jnp.bfloat16), xn.astype(jnp.bfloat16),
                       preferred_element_type=jnp.float32)
    else:
        pred = jnp.dot(w, xn, preferred_element_type=jnp.float32)
    pred = pred + b_ref[...]                                   # (P,1) lane-broadcast

    # RevIN denormalize with rscale = 1/scale == std/gamma (exact reciprocal:
    # gamma can be near zero after training).
    rscale = pl.reciprocal(scale, approx=False)
    out_ref[...] = (pred - beta) * rscale + mean
    mean_ref[...] = mean
    std_ref[...] = std


def fused_pipeline_folded(x2, w, b2, g2, bt2, *, lane_tile=None,
                          use_bf16_matmul=False):
    """normalize -> fm -> denormalize on data already in the folded (L, Ncols)
    layout (Ncols a multiple of the lane tile).  One pallas_call; the only HBM
    outputs are the denormalized prediction and the (1, Ncols) RevIN stats."""
    L, n_cols = x2.shape
    P = w.shape[0]
    tile = lane_tile if lane_tile is not None else _choose_lane_tile(L, P, n_cols)
    assert n_cols % tile == 0, "folded column count must be a multiple of the lane tile"
    nt = n_cols // tile

    flops = 2 * P * L * n_cols + 10 * L * n_cols
    bytes_accessed = 4 * ((L + P + 4) * n_cols + P * L + P)

    kernel = functools.partial(_fused_kernel, use_bf16_matmul=use_bf16_matmul)
    out2, mean2, std2 = pl.pallas_call(
        kernel,
        out_shape=(jax.ShapeDtypeStruct((P, n_cols), jnp.float32),
                   jax.ShapeDtypeStruct((1, n_cols), jnp.float32),
                   jax.ShapeDtypeStruct((1, n_cols), jnp.float32)),
        grid=(nt,),
        in_specs=[
            pl.BlockSpec((L, tile), lambda j: (0, j)),     # x (folded)
            pl.BlockSpec((P, L), lambda j: (0, 0)),        # W   (fetched once)
            pl.BlockSpec((P, 1), lambda j: (0, 0)),        # bias
            pl.BlockSpec((1, tile), lambda j: (0, j)),     # gamma (tiled)
            pl.BlockSpec((1, tile), lambda j: (0, j)),     # beta  (tiled)
        ],
        out_specs=(
            pl.BlockSpec((P, tile), lambda j: (0, j)),     # out (denormalized)
            pl.BlockSpec((1, tile), lambda j: (0, j)),     # mean
            pl.BlockSpec((1, tile), lambda j: (0, j)),     # std
        ),
        compiler_params=pltpu.CompilerParams(
            dimension_semantics=("parallel",),
            vmem_limit_bytes=32 * 1024 * 1024),
        cost_estimate=pl.CostEstimate(flops=int(flops), transcendentals=int(n_cols),
                                      bytes_accessed=int(bytes_accessed)),
    )(x2, w, b2, g2, bt2)
    return out2, mean2, std2


@functools.partial(jax.jit, static_argnames=("lane_tile", "use_bf16_matmul"))
def _fused_predict_impl(x, w, b2, g2, bt2, *, lane_tile, use_bf16_matmul):
    """(B,L,C) wrapper: single fold+pad of x (fused under jit), fused kernel,
    and one small unfold of out / mean / std back to (B, ., C)."""
    B, L, C = x.shape
    n_pad = g2.shape[1]
    x2 = _fold_x(x, n_pad)
    out2, mean2, std2 = fused_pipeline_folded(
        x2, w, b2, g2, bt2, lane_tile=lane_tile, use_bf16_matmul=use_bf16_matmul)
    return _unfold(out2, B, C), _unfold(mean2, B, C), _unfold(std2, B, C)


# ----------------------------------------------------------------------------
# Per-method kernels (API-compatible path).  Original (B, ., C) layout,
# per-batch grid -> zero wrapper transposes.
# ----------------------------------------------------------------------------
def _normalize_kernel(x_ref, g_ref, bt_ref, xn_ref, mean_ref, std_ref):
    x = x_ref[0]                                       # (L, C)
    L = x.shape[0]
    mean = jnp.sum(x, axis=0, keepdims=True) * (1.0 / L)
    diff = x - mean
    var = jnp.sum(diff * diff, axis=0, keepdims=True) * (1.0 / L)
    std = jnp.sqrt(var + EPS)
    scale = g_ref[...] * pl.reciprocal(std, approx=False)
    xn_ref[0] = x * scale + (bt_ref[...] - mean * scale)
    mean_ref[0] = mean
    std_ref[0] = std


def revin_normalize(x, gamma, beta):
    B, L, C = x.shape
    return pl.pallas_call(
        _normalize_kernel,
        out_shape=(jax.ShapeDtypeStruct((B, L, C), jnp.float32),
                   jax.ShapeDtypeStruct((B, 1, C), jnp.float32),
                   jax.ShapeDtypeStruct((B, 1, C), jnp.float32)),
        grid=(B,),
        in_specs=[
            pl.BlockSpec((1, L, C), lambda b: (b, 0, 0)),
            pl.BlockSpec((1, C), lambda b: (0, 0)),
            pl.BlockSpec((1, C), lambda b: (0, 0)),
        ],
        out_specs=(
            pl.BlockSpec((1, L, C), lambda b: (b, 0, 0)),
            pl.BlockSpec((1, 1, C), lambda b: (b, 0, 0)),
            pl.BlockSpec((1, 1, C), lambda b: (b, 0, 0)),
        ),
        compiler_params=pltpu.CompilerParams(dimension_semantics=("parallel",)),
    )(x, gamma, beta)


def _forecast_kernel(x_ref, w_ref, b_ref, o_ref):
    o_ref[0] = (jnp.dot(w_ref[...], x_ref[0], preferred_element_type=jnp.float32)
                + b_ref[...])


def linear_forecast(x, w, b2):
    B, L, C = x.shape
    P = w.shape[0]
    return pl.pallas_call(
        _forecast_kernel,
        out_shape=jax.ShapeDtypeStruct((B, P, C), jnp.float32),
        grid=(B,),
        in_specs=[
            pl.BlockSpec((1, L, C), lambda b: (b, 0, 0)),
            pl.BlockSpec((P, L), lambda b: (0, 0)),
            pl.BlockSpec((P, 1), lambda b: (0, 0)),
        ],
        out_specs=pl.BlockSpec((1, P, C), lambda b: (b, 0, 0)),
        compiler_params=pltpu.CompilerParams(dimension_semantics=("parallel",)),
    )(x, w, b2)


def _denorm_kernel(p_ref, g_ref, bt_ref, m_ref, s_ref, o_ref):
    rscale = s_ref[0] * pl.reciprocal(g_ref[...], approx=False)   # std / gamma
    o_ref[0] = (p_ref[0] - bt_ref[...]) * rscale + m_ref[0]


def revin_denormalize(pred, gamma, beta, mean, std):
    B, P, C = pred.shape
    return pl.pallas_call(
        _denorm_kernel,
        out_shape=jax.ShapeDtypeStruct((B, P, C), jnp.float32),
        grid=(B,),
        in_specs=[
            pl.BlockSpec((1, P, C), lambda b: (b, 0, 0)),
            pl.BlockSpec((1, C), lambda b: (0, 0)),
            pl.BlockSpec((1, C), lambda b: (0, 0)),
            pl.BlockSpec((1, 1, C), lambda b: (b, 0, 0)),
            pl.BlockSpec((1, 1, C), lambda b: (b, 0, 0)),
        ],
        out_specs=pl.BlockSpec((1, P, C), lambda b: (b, 0, 0)),
        compiler_params=pltpu.CompilerParams(dimension_semantics=("parallel",)),
    )(pred, gamma, beta, mean, std)


# ----------------------------------------------------------------------------
# Model wrapper mirroring the PyTorch class (non-'former' branch, nm = RevIN).
# ----------------------------------------------------------------------------
class PallasModel:
    """predict(x) / __call__(x) is the optimized path: the whole
    normalize -> fm -> denormalize chain in ONE fused pallas_call whose only
    HBM outputs are the denormalized prediction and the tiny RevIN stats.
    normalize / forward / denormalize are kept for API compatibility (they must
    return real tensors, so each materializes its own output)."""

    def __init__(self, f_model_type, fm_params, nm_params):
        self.f_model_type = f_model_type
        w, bias = fm_params
        self.w = jnp.asarray(w, jnp.float32)                         # (P, L)
        self.b2 = jnp.asarray(bias, jnp.float32).reshape(-1, 1)      # (P, 1) once
        gamma, beta = nm_params
        self.gamma = jnp.asarray(gamma, jnp.float32).reshape(1, -1)  # (1, C)
        self.beta = jnp.asarray(beta, jnp.float32).reshape(1, -1)    # (1, C)
        self._folded = {}        # (B, n_pad) -> cached tiled/padded gamma & beta
        self._mean = None        # RevIN state, (B, 1, C)
        self._std = None

    # ---- fused fast path ----------------------------------------------------
    def _folded_affine(self, B, n_pad):
        key = (B, n_pad)
        if key not in self._folded:
            g2 = _pad_cols(jnp.tile(self.gamma, (1, B)), n_pad, 1.0)
            bt2 = _pad_cols(jnp.tile(self.beta, (1, B)), n_pad, 0.0)
            self._folded[key] = (g2, bt2)
        return self._folded[key]

    def predict(self, batch_x, *, use_bf16_matmul=False):
        B, L, C = batch_x.shape
        P = self.w.shape[0]
        tile = _choose_lane_tile(L, P, B * C)
        n_pad = _round_up(B * C, tile)
        g2, bt2 = self._folded_affine(B, n_pad)
        out, mean, std = _fused_predict_impl(
            batch_x, self.w, self.b2, g2, bt2,
            lane_tile=tile, use_bf16_matmul=use_bf16_matmul)
        self._mean, self._std = mean, std        # keep RevIN state for later calls
        return out

    __call__ = predict

    # ---- API-compatible per-method path --------------------------------------
    def normalize(self, batch_x, batch_x_enc=None, dec_inp=None, dec_inp_enc=None):
        xn, mean, std = revin_normalize(batch_x, self.gamma, self.beta)
        self._mean, self._std = mean, std
        return xn, dec_inp

    def forward(self, batch_x, batch_x_enc=None, dec_inp=None, dec_inp_enc=None):
        # 'former' not in f_model_type -> pred = fm(batch_x)
        return linear_forecast(batch_x, self.w, self.b2)

    def denormalize(self, pred):
        return revin_denormalize(pred, self.gamma, self.beta, self._mean, self._std)


# ----------------------------------------------------------------------------
# Pure-JAX reference for correctness checks.
# ----------------------------------------------------------------------------
def reference_pipeline(x, w, bias, gamma, beta):
    mean = jnp.mean(x, axis=1, keepdims=True)
    var = jnp.mean((x - mean) ** 2, axis=1, keepdims=True)
    std = jnp.sqrt(var + EPS)
    xn = (x - mean) / std * gamma + beta
    pred = jnp.einsum("pl,blc->bpc", w, xn) + bias[None, :, None]
    out = (pred - beta) / gamma * std + mean
    return xn, pred, out


if __name__ == "__main__":
    def check(name, got, want, atol=1e-4, rtol=1e-4):
        assert jnp.allclose(got, want, atol=atol, rtol=rtol), f"{name} mismatch"

    key = jax.random.PRNGKey(0)
    # Small demo shape + a larger one that exercises multi-tile lane blocking
    # (B*C = 1280 -> 10 grid steps of 128 lanes).
    for (B, L, C, P) in [(2, 16, 4, 8), (8, 64, 160, 24)]:
        key, k_x, k_w, k_b, k_g = jax.random.split(key, 5)
        x = jax.random.normal(k_x, (B, L, C), dtype=jnp.float32)
        w = jax.random.normal(k_w, (P, L), dtype=jnp.float32) * 0.1
        bias = jax.random.normal(k_b, (P,), dtype=jnp.float32) * 0.01
        gamma = (jnp.ones((1, C), dtype=jnp.float32)
                 + 0.1 * jax.random.normal(k_g, (1, C), dtype=jnp.float32))
        beta = jnp.full((1, C), 0.05, dtype=jnp.float32)

        model = PallasModel("DLinear", (w, bias), (gamma, beta))
        xn_ref, pred_ref, out_ref = reference_pipeline(x, w, bias, gamma, beta)

        # Optimized fused chain: one pallas_call, only `out` (+stats) hits HBM.
        out_fused = model.predict(x)
        jax.block_until_ready(out_fused)
        check("fused out", out_fused, out_ref)

        # API-compatible step-by-step path (normalize -> forward -> denormalize).
        xn, _ = model.normalize(x)
        pred = model.forward(xn)
        out = model.denormalize(pred)
        jax.block_until_ready(out)
        check("normalize", xn, xn_ref)
        check("forward", pred, pred_ref)
        check("denormalize", out, out_ref)

    # TODO(synk): 'former' branch (fm(batch_x, enc, dec_inp, dec_enc)) and the
    # SAN / DishTS / No norm-model variants are not instantiated here.
    print("KERNEL_OK")
</pallas_src>

<mosaic_0001>
module attributes {stable_mosaic.version = 11 : i64} {
  func.func @_fused_kernel(%arg0: i32, %arg1: memref<16x128xf32, #tpu.memory_space<vmem>>, %arg2: memref<8x16xf32, #tpu.memory_space<vmem>>, %arg3: memref<8x1xf32, #tpu.memory_space<vmem>>, %arg4: memref<1x128xf32, #tpu.memory_space<vmem>>, %arg5: memref<1x128xf32, #tpu.memory_space<vmem>>, %arg6: memref<8x128xf32, #tpu.memory_space<vmem>>, %arg7: memref<1x128xf32, #tpu.memory_space<vmem>>, %arg8: memref<1x128xf32, #tpu.memory_space<vmem>>) attributes {dimension_semantics = [#tpu.dimension_semantics<parallel>], iteration_bounds = array<i64: 1>, scalar_prefetch = 0 : i64, scratch_operands = 0 : i64, tpu.core_type = #tpu.core_type<tc>, window_params = [{transform_indices = @transform_0, window_bounds = array<i64: 16, 128>}, {pipeline_mode = #tpu.pipeline_mode<synchronous>, transform_indices = @transform_1, window_bounds = array<i64: 8, 16>}, {pipeline_mode = #tpu.pipeline_mode<synchronous>, transform_indices = @transform_2, window_bounds = array<i64: 8, 1>}, {transform_indices = @transform_3, window_bounds = array<i64: 1, 128>}, {transform_indices = @transform_4, window_bounds = array<i64: 1, 128>}, {transform_indices = @transform_5, window_bounds = array<i64: 8, 128>}, {transform_indices = @transform_6, window_bounds = array<i64: 1, 128>}, {transform_indices = @transform_7, window_bounds = array<i64: 1, 128>}]} {
    %c0 = arith.constant 0 : index
    %c0_0 = arith.constant 0 : index
    %0 = vector.load %arg1[%c0, %c0_0] : memref<16x128xf32, #tpu.memory_space<vmem>>, vector<16x128xf32>
    %c0_1 = arith.constant 0 : index
    %c0_2 = arith.constant 0 : index
    %1 = vector.load %arg4[%c0_1, %c0_2] : memref<1x128xf32, #tpu.memory_space<vmem>>, vector<1x128xf32>
    %c0_3 = arith.constant 0 : index
    %c0_4 = arith.constant 0 : index
    %2 = vector.load %arg5[%c0_3, %c0_4] : memref<1x128xf32, #tpu.memory_space<vmem>>, vector<1x128xf32>
    %cst = arith.constant dense<0.000000e+00> : vector<128xf32>
    %3 = vector.multi_reduction <add>, %0, %cst [0] : vector<16x128xf32> to vector<128xf32>
    %4 = vector.shape_cast %3 : vector<128xf32> to vector<1x128xf32>
    %cst_5 = arith.constant 6.250000e-02 : f32
    %5 = vector.broadcast %cst_5 : f32 to vector<1x128xf32>
    %6 = arith.mulf %4, %5 : vector<1x128xf32>
    %7 = vector.broadcast %6 : vector<1x128xf32> to vector<16x128xf32>
    %8 = arith.subf %0, %7 : vector<16x128xf32>
    %9 = arith.mulf %8, %8 : vector<16x128xf32>
    %cst_6 = arith.constant dense<0.000000e+00> : vector<128xf32>
    %10 = vector.multi_reduction <add>, %9, %cst_6 [0] : vector<16x128xf32> to vector<128xf32>
    %11 = vector.shape_cast %10 : vector<128xf32> to vector<1x128xf32>
    %cst_7 = arith.constant 6.250000e-02 : f32
    %12 = vector.broadcast %cst_7 : f32 to vector<1x128xf32>
    %13 = arith.mulf %11, %12 : vector<1x128xf32>
    %cst_8 = arith.constant 9.99999974E-6 : f32
    %14 = vector.broadcast %cst_8 : f32 to vector<1x128xf32>
    %15 = arith.addf %13, %14 : vector<1x128xf32>
    %16 = math.sqrt %15 : vector<1x128xf32>
    %17 = tpu.reciprocal %16 : vector<1x128xf32> -> vector<1x128xf32>
    %18 = arith.mulf %1, %17 : vector<1x128xf32>
    %19 = arith.mulf %6, %18 : vector<1x128xf32>
    %20 = arith.subf %2, %19 : vector<1x128xf32>
    %21 = vector.broadcast %18 : vector<1x128xf32> to vector<16x128xf32>
    %22 = arith.mulf %0, %21 : vector<16x128xf32>
    %23 = vector.broadcast %20 : vector<1x128xf32> to vector<16x128xf32>
    %24 = arith.addf %22, %23 : vector<16x128xf32>
    %c0_9 = arith.constant 0 : index
    %c0_10 = arith.constant 0 : index
    %25 = vector.load %arg2[%c0_9, %c0_10] : memref<8x16xf32, #tpu.memory_space<vmem>>, vector<8x16xf32>
    %cst_11 = arith.constant dense<0.000000e+00> : vector<8x128xf32>
    %26 = tpu.matmul %25, %24, %cst_11 {dimension_numbers = #tpu.dot_dimension_numbers<[1], [0], [0], [1], [0, 0, 1, 1], [], []>} : vector<8x16xf32>, vector<16x128xf32>, vector<8x128xf32> -> vector<8x128xf32>
    %c0_12 = arith.constant 0 : index
    %c0_13 = arith.constant 0 : index
    %27 = vector.load %arg3[%c0_12, %c0_13] : memref<8x1xf32, #tpu.memory_space<vmem>>, vector<8x1xf32>
    %28 = vector.broadcast %27 : vector<8x1xf32> to vector<8x128xf32>
    %29 = arith.addf %26, %28 : vector<8x128xf32>
    %30 = tpu.reciprocal %18 : vector<1x128xf32> -> vector<1x128xf32>
    %31 = vector.broadcast %2 : vector<1x128xf32> to vector<8x128xf32>
    %32 = arith.subf %29, %31 : vector<8x128xf32>
    %33 = vector.broadcast %30 : vector<1x128xf32> to vector<8x128xf32>
    %34 = arith.mulf %32, %33 : vector<8x128xf32>
    %35 = vector.broadcast %6 : vector<1x128xf32> to vector<8x128xf32>
    %36 = arith.addf %34, %35 : vector<8x128xf32>
    %c0_14 = arith.constant 0 : index
    %c0_15 = arith.constant 0 : index
    %37 = vector.load %arg6[%c0_14, %c0_15] : memref<8x128xf32, #tpu.memory_space<vmem>>, vector<8x128xf32>
    tpu.vector_store %arg6[%c0_14, %c0_15], %36 {strides = array<i32>} : memref<8x128xf32, #tpu.memory_space<vmem>>, vector<8x128xf32>,
    %c0_16 = arith.constant 0 : index
    %c0_17 = arith.constant 0 : index
    %38 = vector.load %arg7[%c0_16, %c0_17] : memref<1x128xf32, #tpu.memory_space<vmem>>, vector<1x128xf32>
    tpu.vector_store %arg7[%c0_16, %c0_17], %6 {strides = array<i32>} : memref<1x128xf32, #tpu.memory_space<vmem>>, vector<1x128xf32>,
    %c0_18 = arith.constant 0 : index
    %c0_19 = arith.constant 0 : index
    %39 = vector.load %arg8[%c0_18, %c0_19] : memref<1x128xf32, #tpu.memory_space<vmem>>, vector<1x128xf32>
    tpu.vector_store %arg8[%c0_18, %c0_19], %16 {strides = array<i32>} : memref<1x128xf32, #tpu.memory_space<vmem>>, vector<1x128xf32>,
    return
  }
  func.func @transform_0(%arg0: i32) -> (i32, i32) {
    %c0_i32 = arith.constant 0 : i32
    %c0_i32_0 = arith.constant 0 : i32
    return %c0_i32, %arg0 : i32, i32
  }
  func.func @transform_1(%arg0: i32) -> (i32, i32) {
    %c0_i32 = arith.constant 0 : i32
    %c0_i32_0 = arith.constant 0 : i32
    %c0_i32_1 = arith.constant 0 : i32
    return %c0_i32, %c0_i32_0 : i32, i32
  }
  func.func @transform_2(%arg0: i32) -> (i32, i32) {
    %c0_i32 = arith.constant 0 : i32
    %c0_i32_0 = arith.constant 0 : i32
    %c0_i32_1 = arith.constant 0 : i32
    return %c0_i32, %c0_i32_0 : i32, i32
  }
  func.func @transform_3(%arg0: i32) -> (i32, i32) {
    %c0_i32 = arith.constant 0 : i32
    %c0_i32_0 = arith.constant 0 : i32
    return %c0_i32, %arg0 : i32, i32
  }
  func.func @transform_4(%arg0: i32) -> (i32, i32) {
    %c0_i32 = arith.constant 0 : i32
    %c0_i32_0 = arith.constant 0 : i32
    return %c0_i32, %arg0 : i32, i32
  }
  func.func @transform_5(%arg0: i32) -> (i32, i32) {
    %c0_i32 = arith.constant 0 : i32
    %c0_i32_0 = arith.constant 0 : i32
    return %c0_i32, %arg0 : i32, i32
  }
  func.func @transform_6(%arg0: i32) -> (i32, i32) {
    %c0_i32 = arith.constant 0 : i32
    %c0_i32_0 = arith.constant 0 : i32
    return %c0_i32, %arg0 : i32, i32
  }
  func.func @transform_7(%arg0: i32) -> (i32, i32) {
    %c0_i32 = arith.constant 0 : i32
    %c0_i32_0 = arith.constant 0 : i32
    return %c0_i32, %arg0 : i32, i32
  }
}

</mosaic_0001>

<bundles_post_ra>
// kernel: _fused_predict_impl.1
= control target key start
LH: loop header
LB: loop body
LE: loop exit
PB: predicated region body
PF: predicated region fallthrough
CT: control target
= control target key end

     0   :  { %v208_v0 = vmov 0.0   ;;  %vm209_vm0 = vmmov 0   ;;  %v210_v4 = vmov 0   ;;  %v60_v31 = vlaneseq  ;;  %s281_s0 = inlined_call_operand.vmem [shape: f32[16,128], index: 0, kind: input, shape index: {}]   ;;  %s282_s2 = inlined_call_operand.vmem [shape: f32[8,1], index: 2, kind: input, shape index: {}]   ;;  %s283_s6 = inlined_call_operand.vmem [shape: f32[1,128], index: 6, kind: output, shape index: {1}]   ;;  %s284_s7 = inlined_call_operand.vmem [shape: f32[1,128], index: 7, kind: output, shape index: {2}]   ;;  %s285_s3 = inlined_call_operand.vmem [shape: f32[1,128], index: 3, kind: input, shape index: {}]   ;;  %s286_s4 = inlined_call_operand.vmem [shape: f32[1,128], index: 4, kind: input, shape index: {}]   ;;  %s287_s1 = inlined_call_operand.vmem [shape: f32[8,16], index: 1, kind: input, shape index: {}]   ;;  %s288_s5 = inlined_call_operand.vmem [shape: f32[8,128], index: 5, kind: output, shape index: {0}]  }
   0x1   :  { %191 = vmatprep.subr.mxu0 %v208_v0  ;;  %v23_v1 = vld [vmem:[%s281_s0] sm:$0xff]  ;;  %v24_v2 = vld [vmem:[%s281_s0 + $0x8] sm:$0xff]  ;;  %195 = vmatprep.mubr.msk.f32.mxu0 %vm209_vm0, %v208_v0  ;;  %vm82_vm3 = vcmask 130048  }
   0x2   :  { %v27_v3 = vadd.f32 %v24_v2, %v23_v1  ;;  %201 = vset.pattern.permute.xlu0 %v210_v4  ;;  %v76_v5 = vld [vmem:[%s282_s2] sm:$0xff]  ;;  %v61_v32 = vshrl.u32 %v60_v31, 7 }
   0x3   :  { %79 = vperm.xlu0 %201, %v76_v5   ;;  %v25_v33 = vld [vmem:[%s285_s3] sm:$0x1] }
   0x4   :  { %v28_v6 = vrot.slane %v27_v3, 4  ;;  %v62_v34 = vsub.s32 0, %v61_v32  ;;  %v26_v37 = vld [vmem:[%s286_s4] sm:$0x1] }
   0x5   :  { %v75_v46 = vld [vmem:[%s287_s1] sm:$0xff] }
   0x6   :  { %v29_v7 = vadd.f32 %v28_v6, %v27_v3  ;;  %v161_v49 = vrot.slane %v26_v37, %v62_v34 }
   0x8   :  { %v30_v8 = vrot.slane %v29_v7, 2 }
   0xa   :  { %v31_v9 = vadd.f32 %v30_v8, %v29_v7 }
   0xc   :  { %v32_v10 = vrot.slane %v31_v9, 1 }
   0xe   :  { %v33_v11 = vadd.f32 %v32_v10, %v31_v9 }
  0x10   :  { %v34_v12 = vmul.f32 0.0625, %v33_v11 }
  0x12   :  { %v35_v13 = vsub.f32 %v23_v1, %v34_v12  ;;  %v36_v14 = vsub.f32 %v24_v2, %v34_v12  ;;  %173 = vst [vmem:[%s283_s6] sm:$0x1] %v34_v12 }
  0x14   :  { %v37_v15 = vmul.f32 %v35_v13, %v35_v13  ;;  %v38_v16 = vmul.f32 %v36_v14, %v36_v14 }
  0x16   :  { %v39_v17 = vadd.f32 %v38_v16, %v37_v15 }
  0x18   :  { %v40_v18 = vrot.slane %v39_v17, 4 }
  0x1a   :  { %v41_v19 = vadd.f32 %v40_v18, %v39_v17 }
  0x1c   :  { %v42_v20 = vrot.slane %v41_v19, 2 }
  0x1e   :  { %v43_v21 = vadd.f32 %v42_v20, %v41_v19 }
  0x20   :  { %v44_v22 = vrot.slane %v43_v21, 1 }
  0x22   :  { %v45_v23 = vadd.f32 %v44_v22, %v43_v21 }
  0x24   :  { %v46_v24 = vmul.f32 0.0625, %v45_v23 }
  0x26   :  { %v47_v25 = vadd.f32 1e-05, %v46_v24 }
  0x28   :  { %202 = vrsqrt.f32 %v47_v25  ;;  %vm50_vm1 = vcmp.eq.f32.partialorder %v47_v25, inf  ;;  %v53_v27 = vand.u32 2147483648, %v47_v25  ;;  %vm52_vm2 = vcmp.eq.f32.partialorder %v47_v25, 0.0 }
  0x35   :  { %v203_v26 = vpop.eup %202 }
  0x36   :  { %v49_v28 = vmul.f32 %v203_v26, %v47_v25 }
  0x38   :  { %v51_v29 = vsel %vm50_vm1, %v47_v25, %v49_v28 }
  0x39   :  { %v54_v30 = vsel %vm52_vm2, %v53_v27, %v51_v29 }
  0x3a   :  { %204 = vrcp.f32 %v54_v30  ;;  %174 = vst [vmem:[%s284_s7] sm:$0x1] %v54_v30 }
  0x47   :  { %v205_v35 = vpop.eup %204 }
  0x48   :  { %v56_v36 = vmul.f32 %v205_v35, %v25_v33 }
  0x4a   :  { %v57_v38 = vmul.f32 %v56_v36, %v34_v12  ;;  %v63_v39 = vrot.slane %v56_v36, %v62_v34  ;;  %206 = vrcp.f32 %v56_v36 }
  0x4c   :  { %v58_v40 = vsub.f32 %v26_v37, %v57_v38  ;;  %v66_v41 = vmul.f32 %v63_v39, %v24_v2  ;;  %v65_v42 = vmul.f32 %v63_v39, %v23_v1 }
  0x4e   :  { %v71_v43 = vrot.slane %v58_v40, %v62_v34 }
  0x50   :  { %v74_v44 = vadd.f32 %v71_v43, %v66_v41  ;;  %v73_v45 = vadd.f32 %v71_v43, %v65_v42 }
  0x52   :  { %192 = vmatpush3.msra.mxu0 %v74_v44 }
  0x53   :  { %193 = vmatprep.subr.mxu0 %v208_v0 }
  0x54   :  { %194 = vmatpush3.msra.mxu0 %v73_v45 }
  0x55   :  { %196 = vmatmul.mubr.msk.f32.vlgmr.msra.gmra.mxu0 %vm82_vm3, %v75_v46 }
  0x57   :  { %v207_v47 = vpop.eup %206 }
  0x58   :  { %v168_v52 = vrot.slane %v207_v47, %v62_v34 }
  0x7e   :  { %v80_v48 = vpop.permute.xlu0 %79 }
 0x115   :  { %v152_v50 = vpop.f32.mrf.mxu0 }
 0x116   :  { %v153_v51 = vadd.f32 %v152_v50, %v80_v48 }
 0x117   :  { %v197_v53 = vpop.f32.mrf.mxu0 }
 0x118   :  { %v163_v54 = vsub.f32 %v153_v51, %v161_v49 }
 0x11a   :  { %v170_v55 = vmul.f32 %v168_v52, %v163_v54 }
 0x11c   :  { %v171_v56 = vadd.f32 %v170_v55, %v34_v12 }
 0x11e   :  { %172 = vst [vmem:[%s288_s5] sm:$0xff] %v171_v56 }

</bundles_post_ra>
